<compile_context>
chip_gen: v5e
topology: v5e:2x2
jax: 0.10.0
libtpu: 0.0.40
codegen_flags: <defaults>
</compile_context>

<pallas_src>
import functools

import jax
import jax.numpy as jnp
from jax.experimental import pallas as pl
from jax.experimental.pallas import tpu as pltpu


# ----------------------------------------------------------------------------
# Synthetic stand-in for the HRNet `config` object referenced by the module.
# ----------------------------------------------------------------------------
class _Cfg:
    NUM_OUTPUTS = 1
    BALANCE_WEIGHTS = (1.0,)
    SB_WEIGHTS = 1.0


config = _Cfg()


# ----------------------------------------------------------------------------
# Pallas kernel: per-pixel cross entropy with ignore_index, accumulated
# per (image, chunk) into a lane-dense (1, 128) partial [sum, count, 0, ...].
# ----------------------------------------------------------------------------
def _ce_kernel(score_ref, target_ref, out_ref, acc_ref, *,
               ignore_label, hw_total, tile, inner_blocks, exp_in_bf16):
    c_idx = pl.program_id(1)                                 # H*W chunk index
    j = pl.program_id(2)                                     # block within chunk

    @pl.when(j == 0)
    def _():
        acc_ref[...] = jnp.zeros_like(acc_ref)

    logits = score_ref[0].astype(jnp.float32)                # (C, T) classes on sublanes
    labels = target_ref[0].astype(jnp.int32)                 # (1, T)
    C, T = logits.shape

    # numerically stable log-sum-exp over the class (sublane) axis
    m = jnp.max(logits, axis=0, keepdims=True)               # (1, T)
    z = logits - m
    if exp_in_bf16:
        # v7x-only option: EUP bf16 exp (~2x); keep max/sum/lse in f32.
        z = z.astype(jnp.bfloat16)
    lse = m + jnp.log(jnp.sum(jnp.exp(z).astype(jnp.float32),
                              axis=0, keepdims=True))        # (1, T)

    # gather logit at the target class via a one-hot select along C.
    # cls iota is (C, 1) and j-independent; the compare broadcasts to (C, T).
    cls = jax.lax.broadcasted_iota(jnp.int32, (C, 1), 0)
    tgt_logit = jnp.sum(jnp.where(cls == labels, logits, 0.0),
                        axis=0, keepdims=True)               # (1, T)
    # TODO(synk): out-of-range labels (>= C, != ignore) contribute loss = lse
    # instead of erroring like PyTorch; targets are assumed trusted.

    # validity: not ignore_label AND inside the real H*W extent.  The column
    # bound is expressed as a scalar "remaining" so the lane iota is fixed.
    blk = c_idx * inner_blocks + j                           # logical block idx
    remaining = hw_total - blk * tile                        # scalar int32
    lane = jax.lax.broadcasted_iota(jnp.int32, (1, T), 1)
    valid = jnp.logical_and(labels != ignore_label, lane < remaining)

    # jnp.where (not multiply) so garbage/NaN in out-of-bounds columns can't leak
    loss = jnp.where(valid, lse - tgt_logit, 0.0)            # (1, T)

    acc_ref[0:1, :] += loss
    acc_ref[1:2, :] += valid.astype(jnp.float32)

    @pl.when(j == pl.num_programs(2) - 1)
    def _():
        total = jnp.sum(acc_ref[0:1, :])                     # one reduce per chunk
        count = jnp.sum(acc_ref[1:2, :])
        lane128 = jax.lax.broadcasted_iota(jnp.int32, (1, 128), 1)
        out_ref[0] = jnp.where(lane128 == 0, total,
                               jnp.where(lane128 == 1, count, 0.0))


def _cross_entropy_mean(score_nchw, target_nhw, *, ignore_label=-1,
                        tile_hw=None, approx_exp_bf16=False):
    """nn.CrossEntropyLoss(ignore_index=ignore_label) mean loss via Pallas.

    Accepts f32 or bf16 `score_nchw` (keep it bf16 for ~2x HBM traffic savings;
    accumulation is always f32 in-kernel) and int8/int16/int32 targets.
    """
    N, C, H, W = score_nchw.shape
    HW = H * W

    # Pure reshapes (no transpose): NCHW stays in its native layout.
    score = score_nchw.reshape(N, C, HW)
    if target_nhw.dtype not in (jnp.int8, jnp.int16, jnp.int32):
        target_nhw = target_nhw.astype(jnp.int32)            # only widen exotic dtypes
    target = target_nhw.reshape(N, 1, HW)

    s_item = score.dtype.itemsize
    t_item = target.dtype.itemsize

    # ---- per-generation VMEM budget -------------------------------------
    try:
        info = pltpu.get_tpu_info()
        phys_vmem = int(getattr(info, "vmem_capacity_bytes", 128 * 1024 * 1024))
    except Exception:  # pragma: no cover - conservative fallback
        phys_vmem = 128 * 1024 * 1024
    if phys_vmem <= 64 * 1024 * 1024:        # v7x-class: 64 MiB physical
        vmem_limit = 48 * 1024 * 1024
    else:                                    # v5e / v6e: 128 MiB physical
        vmem_limit = 100 * 1024 * 1024

    def _padded_rows(rows, itemsize):
        sub = 8 * max(1, 4 // itemsize)      # sublane tile (packing-aware)
        return ((rows + sub - 1) // sub) * sub

    # VMEM bytes per pixel column: double-buffered score + target blocks,
    # plus the (2, t) f32 accumulator (padded to 8 sublanes).
    bytes_per_pixel = (2 * _padded_rows(C, s_item) * s_item
                       + 2 * _padded_rows(1, t_item) * t_item
                       + 8 * 4)
    budget = int(vmem_limit * 0.7)           # headroom for out block / internals
    t_cap = max(128, budget // bytes_per_pixel)

    # ---- tile selection ---------------------------------------------------
    if tile_hw is None:
        tile_hw = 65536 if C <= 32 else 32768
    t = int(min(tile_hw, t_cap, HW))
    if t < HW:
        t = max(128, (t // 128) * 128)       # lane-aligned unless full axis
    grid_hw = pl.cdiv(HW, t)

    # Split the H*W blocks into parallel chunks so both v7x TensorCores are
    # used even when N is small (no-op on single-TC v5e/v6e).
    n_chunks = 2 if grid_hw >= 2 else 1
    inner_blocks = pl.cdiv(grid_hw, n_chunks)

    def _blk_idx(c, j):
        # Clamp dummy blocks (when grid_hw is odd) to the last real block; the
        # kernel masks their contribution via the column-validity check.
        return jnp.minimum(c * inner_blocks + j, grid_hw - 1)

    kernel = functools.partial(_ce_kernel, ignore_label=ignore_label,
                               hw_total=HW, tile=t, inner_blocks=inner_blocks,
                               exp_in_bf16=approx_exp_bf16)

    partials = pl.pallas_call(
        kernel,
        out_shape=jax.ShapeDtypeStruct((N, n_chunks, 128), jnp.float32),
        grid_spec=pltpu.PrefetchScalarGridSpec(
            num_scalar_prefetch=0,
            grid=(N, n_chunks, inner_blocks),
            in_specs=[
                pl.BlockSpec((1, C, t), lambda n, c, j: (n, 0, _blk_idx(c, j))),
                pl.BlockSpec((1, 1, t), lambda n, c, j: (n, 0, _blk_idx(c, j))),
            ],
            out_specs=pl.BlockSpec((1, 1, 128), lambda n, c, j: (n, c, 0)),
            scratch_shapes=[pltpu.VMEM((2, t), jnp.float32)],
        ),
        compiler_params=pltpu.CompilerParams(
            dimension_semantics=("parallel", "parallel", "arbitrary"),
            vmem_limit_bytes=vmem_limit),
    )(score, target)

    total = jnp.sum(partials[..., 0])
    count = jnp.sum(partials[..., 1])
    # mean over non-ignored pixels (PyTorch 'mean' reduction with ignore_index).
    # NOTE: all-ignored case returns 0.0 instead of PyTorch's NaN.
    return (total / jnp.maximum(count, 1.0)).astype(jnp.float32)


# ----------------------------------------------------------------------------
# Module-equivalent forward.
# ----------------------------------------------------------------------------
class CrossEntropy:
    def __init__(self, ignore_label=-1, weight=None):
        # TODO(synk): per-class `weight` is unused (HRNet default is None);
        # support would add a class-weight gather in the kernel.
        self.ignore_label = ignore_label

    def _forward(self, score, target):
        return _cross_entropy_mean(score, target, ignore_label=self.ignore_label)

    def __call__(self, score, target):
        if config.NUM_OUTPUTS == 1:
            score = [score]
        balance_weights = config.BALANCE_WEIGHTS
        sb_weights = config.SB_WEIGHTS
        if len(balance_weights) == len(score):
            return sum(w * self._forward(x, target)
                       for w, x in zip(balance_weights, score))
        elif len(score) == 1:
            return sb_weights * self._forward(score[0], target)
        else:
            raise ValueError("lengths of prediction and target are not identical!")


# ----------------------------------------------------------------------------
# Pure-JAX reference for verification.
# ----------------------------------------------------------------------------
def _reference_ce(score_nchw, target_nhw, ignore_label=-1):
    N, C, H, W = score_nchw.shape
    logits = jnp.transpose(score_nchw, (0, 2, 3, 1)).reshape(-1, C).astype(jnp.float32)
    labels = target_nhw.reshape(-1).astype(jnp.int32)
    logp = jax.nn.log_softmax(logits, axis=-1)
    valid = labels != ignore_label
    safe = jnp.where(valid, labels, 0)
    nll = -jnp.take_along_axis(logp, safe[:, None], axis=-1)[:, 0]
    nll = jnp.where(valid, nll, 0.0)
    return jnp.sum(nll) / jnp.maximum(jnp.sum(valid.astype(jnp.float32)), 1.0)


if __name__ == "__main__":
    key = jax.random.PRNGKey(0)
    k1, k2, k3, k4, k5, k6 = jax.random.split(key, 6)

    # --- main check: HRNet-like small shape (single full-axis block) -------
    N, C, H, W = 2, 19, 16, 16          # H*W = 256 pixels, 19 classes
    score = jax.random.normal(k1, (N, C, H, W), dtype=jnp.float32)
    target = jax.random.randint(k2, (N, H, W), 0, C, dtype=jnp.int32)
    ignore_mask = jax.random.bernoulli(k3, 0.2, (N, H, W))
    target = jnp.where(ignore_mask, -1, target)

    criterion = CrossEntropy(ignore_label=-1)
    loss = jax.block_until_ready(criterion(score, target))
    ref = _reference_ce(score, target, ignore_label=-1)
    assert jnp.allclose(loss, ref, atol=1e-5, rtol=1e-5), (loss, ref)

    # --- second check: multi-block, odd block count (dummy/clamped block),
    #     partial last block, both chunks active ----------------------------
    N2, C2, H2, W2 = 2, 19, 20, 29      # H*W = 580; tile 128 -> 5 blocks (odd)
    score2 = jax.random.normal(k4, (N2, C2, H2, W2), dtype=jnp.float32)
    target2 = jax.random.randint(k5, (N2, H2, W2), 0, C2, dtype=jnp.int32)
    target2 = jnp.where(jax.random.bernoulli(k6, 0.2, (N2, H2, W2)), -1, target2)

    loss2 = jax.block_until_ready(
        _cross_entropy_mean(score2, target2, ignore_label=-1, tile_hw=128))
    ref2 = _reference_ce(score2, target2, ignore_label=-1)
    assert jnp.allclose(loss2, ref2, atol=1e-5, rtol=1e-5), (loss2, ref2)

    # --- third check: bf16 scores pass straight into the kernel ------------
    score_bf16 = score.astype(jnp.bfloat16)
    loss3 = jax.block_until_ready(
        _cross_entropy_mean(score_bf16, target, ignore_label=-1))
    ref3 = _reference_ce(score_bf16, target, ignore_label=-1)
    assert jnp.allclose(loss3, ref3, atol=1e-4, rtol=1e-4), (loss3, ref3)

    print("KERNEL_OK")
</pallas_src>

<mosaic_0001>
module attributes {stable_mosaic.version = 11 : i64} {
  func.func @_ce_kernel(%arg0: i32, %arg1: i32, %arg2: i32, %arg3: memref<1x19x256xf32, #tpu.memory_space<vmem>>, %arg4: memref<1x1x256xi32, #tpu.memory_space<vmem>>, %arg5: memref<1x1x128xf32, #tpu.memory_space<vmem>>, %arg6: memref<2x256xf32, #tpu.memory_space<vmem>>) attributes {dimension_semantics = [#tpu.dimension_semantics<parallel>, #tpu.dimension_semantics<parallel>, #tpu.dimension_semantics<arbitrary>], iteration_bounds = array<i64: 2, 1, 1>, scalar_prefetch = 0 : i64, scratch_operands = 1 : i64, tpu.core_type = #tpu.core_type<tc>, window_params = [{transform_indices = @transform_0, window_bounds = array<i64: 1, 19, 256>}, {transform_indices = @transform_1, window_bounds = array<i64: 1, 1, 256>}, {transform_indices = @transform_2, window_bounds = array<i64: 1, 1, 128>}]} {
    %c0_i32 = arith.constant 0 : i32
    %0 = arith.cmpi eq, %arg2, %c0_i32 : i32
    %1 = arith.extui %0 : i1 to i32
    %c0_i32_0 = arith.constant 0 : i32
    %2 = arith.cmpi ne, %1, %c0_i32_0 : i32
    scf.if %2 {
      %cst_20 = arith.constant 0.000000e+00 : f32
      %48 = vector.broadcast %cst_20 : f32 to vector<2x256xf32>
      %c0_21 = arith.constant 0 : index
      %c0_22 = arith.constant 0 : index
      %49 = vector.load %arg6[%c0_21, %c0_22] : memref<2x256xf32, #tpu.memory_space<vmem>>, vector<2x256xf32>
      tpu.vector_store %arg6[%c0_21, %c0_22], %48 {strides = array<i32>} : memref<2x256xf32, #tpu.memory_space<vmem>>, vector<2x256xf32>,
    } else {
    }
    %c0 = arith.constant 0 : index
    %c0_1 = arith.constant 0 : index
    %c0_2 = arith.constant 0 : index
    %3 = vector.load %arg3[%c0, %c0_1, %c0_2] : memref<1x19x256xf32, #tpu.memory_space<vmem>>, vector<1x19x256xf32>
    %4 = vector.shape_cast %3 : vector<1x19x256xf32> to vector<19x256xf32>
    %c0_3 = arith.constant 0 : index
    %c0_4 = arith.constant 0 : index
    %c0_5 = arith.constant 0 : index
    %5 = vector.load %arg4[%c0_3, %c0_4, %c0_5] : memref<1x1x256xi32, #tpu.memory_space<vmem>>, vector<1x1x256xi32>
    %6 = vector.shape_cast %5 : vector<1x1x256xi32> to vector<1x256xi32>
    %cst = arith.constant dense<0xFF800000> : vector<256xf32>
    %7 = vector.multi_reduction <maximumf>, %4, %cst [0] : vector<19x256xf32> to vector<256xf32>
    %8 = vector.shape_cast %7 : vector<256xf32> to vector<1x256xf32>
    %9 = vector.broadcast %8 : vector<1x256xf32> to vector<19x256xf32>
    %10 = arith.subf %4, %9 : vector<19x256xf32>
    %11 = math.exp %10 : vector<19x256xf32>
    %cst_6 = arith.constant dense<0.000000e+00> : vector<256xf32>
    %12 = vector.multi_reduction <add>, %11, %cst_6 [0] : vector<19x256xf32> to vector<256xf32>
    %13 = vector.shape_cast %12 : vector<256xf32> to vector<1x256xf32>
    %14 = math.log %13 : vector<1x256xf32>
    %15 = arith.addf %8, %14 : vector<1x256xf32>
    %16 = tpu.iota {dimensions = array<i32: 0>} : vector<19x1xi32>
    %17 = vector.broadcast %16 : vector<19x1xi32> to vector<19x256xi32>
    %18 = vector.broadcast %6 : vector<1x256xi32> to vector<19x256xi32>
    %19 = arith.cmpi eq, %17, %18 : vector<19x256xi32>
    %cst_7 = arith.constant 0.000000e+00 : f32
    %20 = vector.broadcast %cst_7 : f32 to vector<19x256xf32>
    %21 = arith.select %19, %4, %20 : vector<19x256xi1>, vector<19x256xf32>
    %cst_8 = arith.constant dense<0.000000e+00> : vector<256xf32>
    %22 = vector.multi_reduction <add>, %21, %cst_8 [0] : vector<19x256xf32> to vector<256xf32>
    %23 = vector.shape_cast %22 : vector<256xf32> to vector<1x256xf32>
    %c1_i32 = arith.constant 1 : i32
    %24 = arith.muli %arg1, %c1_i32 : i32
    %25 = arith.addi %24, %arg2 : i32
    %c256_i32 = arith.constant 256 : i32
    %26 = arith.muli %25, %c256_i32 : i32
    %c256_i32_9 = arith.constant 256 : i32
    %27 = arith.subi %c256_i32_9, %26 : i32
    %28 = tpu.iota {dimensions = array<i32: 1>} : vector<1x256xi32>
    %c-1_i32 = arith.constant -1 : i32
    %29 = vector.broadcast %c-1_i32 : i32 to vector<1x256xi32>
    %30 = arith.cmpi ne, %6, %29 : vector<1x256xi32>
    %31 = vector.broadcast %27 : i32 to vector<1x256xi32>
    %32 = arith.cmpi slt, %28, %31 : vector<1x256xi32>
    %33 = arith.andi %30, %32 : vector<1x256xi1>
    %34 = arith.subf %15, %23 : vector<1x256xf32>
    %cst_10 = arith.constant 0.000000e+00 : f32
    %35 = vector.broadcast %cst_10 : f32 to vector<1x256xf32>
    %36 = arith.select %33, %34, %35 : vector<1x256xi1>, vector<1x256xf32>
    %c0_11 = arith.constant 0 : index
    %c0_12 = arith.constant 0 : index
    %37 = vector.load %arg6[%c0_11, %c0_12] : memref<2x256xf32, #tpu.memory_space<vmem>>, vector<1x256xf32>
    %38 = arith.addf %37, %36 : vector<1x256xf32>
    %c0_13 = arith.constant 0 : index
    %c0_14 = arith.constant 0 : index
    %39 = vector.load %arg6[%c0_13, %c0_14] : memref<2x256xf32, #tpu.memory_space<vmem>>, vector<1x256xf32>
    tpu.vector_store %arg6[%c0_13, %c0_14], %38 {strides = array<i32>} : memref<2x256xf32, #tpu.memory_space<vmem>>, vector<1x256xf32>,
    %c1 = arith.constant 1 : index
    %c0_15 = arith.constant 0 : index
    %40 = vector.load %arg6[%c1, %c0_15] : memref<2x256xf32, #tpu.memory_space<vmem>>, vector<1x256xf32>
    %41 = arith.extui %33 : vector<1x256xi1> to vector<1x256xi32>
    %42 = arith.sitofp %41 : vector<1x256xi32> to vector<1x256xf32>
    %43 = arith.addf %40, %42 : vector<1x256xf32>
    %c1_16 = arith.constant 1 : index
    %c0_17 = arith.constant 0 : index
    %44 = vector.load %arg6[%c1_16, %c0_17] : memref<2x256xf32, #tpu.memory_space<vmem>>, vector<1x256xf32>
    tpu.vector_store %arg6[%c1_16, %c0_17], %43 {strides = array<i32>} : memref<2x256xf32, #tpu.memory_space<vmem>>, vector<1x256xf32>,
    %c0_i32_18 = arith.constant 0 : i32
    %45 = arith.cmpi eq, %arg2, %c0_i32_18 : i32
    %46 = arith.extui %45 : i1 to i32
    %c0_i32_19 = arith.constant 0 : i32
    %47 = arith.cmpi ne, %46, %c0_i32_19 : i32
    scf.if %47 {
      %c0_20 = arith.constant 0 : index
      %c0_21 = arith.constant 0 : index
      %48 = vector.load %arg6[%c0_20, %c0_21] : memref<2x256xf32, #tpu.memory_space<vmem>>, vector<1x256xf32>
      %49 = vector.shape_cast %48 : vector<1x256xf32> to vector<1x1x256xf32>
      %cst_22 = arith.constant dense<0.000000e+00> : vector<1xf32>
      %50 = vector.multi_reduction <add>, %49, %cst_22 [1, 2] : vector<1x1x256xf32> to vector<1xf32>
      %51 = vector.shape_cast %50 : vector<1xf32> to vector<1x1x1xf32>
      %52 = vector.extract %51[0, 0, 0] : f32 from vector<1x1x1xf32>
      %c1_23 = arith.constant 1 : index
      %c0_24 = arith.constant 0 : index
      %53 = vector.load %arg6[%c1_23, %c0_24] : memref<2x256xf32, #tpu.memory_space<vmem>>, vector<1x256xf32>
      %54 = vector.shape_cast %53 : vector<1x256xf32> to vector<1x1x256xf32>
      %cst_25 = arith.constant dense<0.000000e+00> : vector<1xf32>
      %55 = vector.multi_reduction <add>, %54, %cst_25 [1, 2] : vector<1x1x256xf32> to vector<1xf32>
      %56 = vector.shape_cast %55 : vector<1xf32> to vector<1x1x1xf32>
      %57 = vector.extract %56[0, 0, 0] : f32 from vector<1x1x1xf32>
      %58 = tpu.iota {dimensions = array<i32: 1>} : vector<1x128xi32>
      %c0_i32_26 = arith.constant 0 : i32
      %59 = vector.broadcast %c0_i32_26 : i32 to vector<1x128xi32>
      %60 = arith.cmpi eq, %58, %59 : vector<1x128xi32>
      %c1_i32_27 = arith.constant 1 : i32
      %61 = vector.broadcast %c1_i32_27 : i32 to vector<1x128xi32>
      %62 = arith.cmpi eq, %58, %61 : vector<1x128xi32>
      %cst_28 = arith.constant 0.000000e+00 : f32
      %63 = vector.broadcast %57 : f32 to vector<1x128xf32>
      %64 = vector.broadcast %cst_28 : f32 to vector<1x128xf32>
      %65 = arith.select %62, %63, %64 : vector<1x128xi1>, vector<1x128xf32>
      %66 = vector.broadcast %52 : f32 to vector<1x128xf32>
      %67 = arith.select %60, %66, %65 : vector<1x128xi1>, vector<1x128xf32>
      %c0_29 = arith.constant 0 : index
      %c0_30 = arith.constant 0 : index
      %c0_31 = arith.constant 0 : index
      %68 = vector.load %arg5[%c0_29, %c0_30, %c0_31] : memref<1x1x128xf32, #tpu.memory_space<vmem>>, vector<1x1x128xf32>
      %69 = vector.shape_cast %68 : vector<1x1x128xf32> to vector<1x128xf32>
      %70 = vector.shape_cast %67 : vector<1x128xf32> to vector<1x1x128xf32>
      tpu.vector_store %arg5[%c0_29, %c0_30, %c0_31], %70 {strides = array<i32>} : memref<1x1x128xf32, #tpu.memory_space<vmem>>, vector<1x1x128xf32>,
    } else {
    }
    return
  }
  func.func @transform_0(%arg0: i32, %arg1: i32, %arg2: i32) -> (i32, i32, i32) {
    %c1_i32 = arith.constant 1 : i32
    %0 = arith.muli %arg1, %c1_i32 : i32
    %1 = arith.addi %0, %arg2 : i32
    %c0_i32 = arith.constant 0 : i32
    %2 = arith.minsi %1, %c0_i32 : i32
    %c0_i32_0 = arith.constant 0 : i32
    %c0_i32_1 = arith.constant 0 : i32
    return %arg0, %c0_i32_0, %2 : i32, i32, i32
  }
  func.func @transform_1(%arg0: i32, %arg1: i32, %arg2: i32) -> (i32, i32, i32) {
    %c1_i32 = arith.constant 1 : i32
    %0 = arith.muli %arg1, %c1_i32 : i32
    %1 = arith.addi %0, %arg2 : i32
    %c0_i32 = arith.constant 0 : i32
    %2 = arith.minsi %1, %c0_i32 : i32
    %c0_i32_0 = arith.constant 0 : i32
    %c0_i32_1 = arith.constant 0 : i32
    return %arg0, %c0_i32_0, %2 : i32, i32, i32
  }
  func.func @transform_2(%arg0: i32, %arg1: i32, %arg2: i32) -> (i32, i32, i32) {
    %c0_i32 = arith.constant 0 : i32
    %c0_i32_0 = arith.constant 0 : i32
    return %arg0, %arg1, %c0_i32 : i32, i32, i32
  }
}

</mosaic_0001>

<bundles_post_ra>
// kernel: tpu_custom_call.1
= control target key start
LH: loop header
LB: loop body
LE: loop exit
PB: predicated region body
PF: predicated region fallthrough
CT: control target
= control target key end

     0   :  { %7 = vsyncpa [#allocation4], 0  ;;  %s883_s0 = inlined_call_operand.vmem [shape: f32[2,19,256], index: 0, kind: input, shape index: {}]   ;;  %s884_s1 = inlined_call_operand.vmem [shape: s32[2,1,256], index: 1, kind: input, shape index: {}]   ;;  %s885_s2 = inlined_call_operand.hbm [shape: f32[2,1,128], index: 2, kind: output, shape index: {}]  }
   0x1   :  { %9 = vsyncpa [#allocation4 + $0x1], 0  ;;  %s733_s9 = smov 0   ;;  %s735_s10 = smov 0  }
   0x2   :  { %s737_s11 = smov 0   ;;  %s739_s12 = smov 0  }
   0x3   :  { %s741_s13 = smov 0   ;;  %s743_s14 = smov 0  }
   0x4 LB: > { %s548_s15 = sadd.s32 4294967295, %s714_s14   ;;  %s549_s16 = sadd.s32 4294967294, %s714_s14   ;;  %s714_s14 = sphi %s743_s14, %s15_s14   ;;  %s710_s13 = sphi %s741_s13, %s896_s13   ;;  %s706_s12 = sphi %s739_s12, %s895_s12   ;;  %s702_s11 = sphi %s737_s11, %s894_s11   ;;  %s698_s10 = sphi %s735_s10, %s893_s10   ;;  %s694_s9 = sphi %s733_s9, %s892_s9  }
   0x5   : > { %s34_s17 = sadd.s32 1, %s710_s13  ;;  %s111_s18 = sadd.s32 1, %s702_s11 }
   0x6   : > { %p36_p0 = scmp.ge.s32.totalorder %s34_s17, 2  ;;  %p121_p1 = scmp.ne.s32.totalorder %s702_s11, %s698_s10 }
   0x7   : > { %p122_p2 = scmp.eq.s32.totalorder %s548_s15, 1  ;;  %p127_p3 = scmp.ne.s32.totalorder %s698_s10, %s694_s9 }
   0x8   : > { %s898_s17 = smov (%p36_p0, %s34_s17), 0  ;;  %p128_p5 = scmp.eq.s32.totalorder %s549_s16, 1 }
   0x9   : > { %p773_p4 = por %p122_p2, %p121_p1  ;;  %s106_s20 = ssub.s32 %s710_s13, %s898_s17 }
   0xa   : > { %p552_p6 = scmp.ge.s32.totalorder %s714_s14, 1  ;;  %p109_p7 = scmp.eq.s32.totalorder %s106_s20, 0 }
   0xb   : > { %p780_p8 = por %p128_p5, %p127_p3  ;;  %p183_p9 = scmp.lt.s32.totalorder %s714_s14, 3 }
   0xc   : > { %s786_s22 = scalar_select %p109_p7, %s702_s11, %s111_s18  }
   0xd   : > { %p184_p10 = pnand %p552_p6, %p183_p9 }
   0xe   : > { %p226_p11 = scmp.lt.s32.totalorder (!%p184_p10), %s706_s12, 1  ;;  %s220_s4 = sand.u32 (!%p184_p10), 1, %s698_s10  }
   0xf   : > { %187 = sbr.rel (%p184_p10) target bundleno = 299 (0x12b), region = 28  ;;  %s456_s7 = scalar_lea.hbm (!%p184_p10), %s885_s2, %s706_s12 }
  0x10   : > { %s221_s8 = scalar_lea.vmem (!%p184_p10), [#allocation3], %s220_s4  ;;  %s460_s18 = sshll.u32 (!%p184_p10), %s456_s7, 4  ;;  %s461_s18 = int_to_ptr.hbm [resolvable:$true] %s460_s18 }
  0x11   : > { %s458_s15 = sshll.u32 (!%p184_p10), %s221_s8, 4  ;;  %s459_s15 = int_to_ptr.vmem [resolvable:$true] %s458_s15 }
  0x14   : > { %v716_v0 = vmov 0.0   ;;  %s227_s23 = scalar_select %p226_p11, %s706_s12, 1  ;;  %vm265_vm0 = vcmask 1042432   ;;  %v326_v17 = vlaneseq  ;;  %v717_v51 = vmov 1  }
  0x15   : > { %257 = vst [vmem:[#allocation2] sm:$0xf] %v716_v0  ;;  %v374_v52 = vrot.slane %v717_v51, 7  ;;  %vm375_vm7 = vcmask 1040384  }
  0x16   : > { %s558_s24 = smul.u32 48, %s227_s23  ;;  %s554_s28 = sshll.u32 %s227_s23, 1  ;;  %v327_v22 = vshrl.u32 %v326_v17, 7  ;;  %vm828_vm11 = vcmp.lt.s32.totalorder %v326_v17, 256 }
  0x17   : > { %s248_s3 = scalar_lea.vmem %s884_s1, %s554_s28  ;;  %v376_v58 = vsel %vm375_vm7, 1, %v374_v52  ;;  %s447_s23 = scalar_lea.sflag [#allocation4], %s220_s4 }
  0x18   : > { %s233_s27 = scalar_lea.vmem %s883_s0, %s558_s24  ;;  %v800_v23 = vld [vmem:[%s248_s3] sm:$0x3]  ;;  %v328_v28 = vadd.s32 8, %v327_v22  ;;  %v329_v37 = vadd.s32 16, %v327_v22  ;;  %vm377_vm9 = vcmp.ne.s32.totalorder %v376_v58, 0  ;;  %s650_s24 = sshra.s32 %s461_s18, 4  ;;  %s651_s24 = int_to_ptr.hbm [resolvable:$true] %s650_s24 }
  0x19   : > { %v258_v1 = vld [vmem:[%s233_s27] sm:$0xff]  ;;  %v259_v2 = vld [vmem:[%s233_s27 + $0x8] sm:$0xff]  ;;  %v260_v5 = vld [vmem:[%s233_s27 + $0x10] sm:$0xff]  ;;  %v330_v29 = vperm.slane %v800_v23, 0  ;;  %v331_v30 = vperm.slane %v800_v23, 1  ;;  %vm368_vm8 = vcmp.ne.s32.totalorder %v800_v23, 4294967295  ;;  %p657_p1 = scmp.lt.s32.totalorder %s651_s24, %s885_s2 }
  0x1a   : > { %v262_v3 = vld [vmem:[%s233_s27 + $0x20] sm:$0x7]  ;;  %v263_v4 = vld [vmem:[%s233_s27 + $0x28] sm:$0x7]  ;;  %v261_v6 = vld [vmem:[%s233_s27 + $0x18] sm:$0xff]  ;;  %s652_s25 = scalar_lea.hbm %s651_s24, 1 }
  0x1b   : > { %v266_v7 = vsel %vm265_vm0, %v262_v3, -inf  ;;  %v275_v8 = vsel %vm265_vm0, %v263_v4, -inf  ;;  %vm332_vm1 = vcmp.eq.s32.totalorder %v327_v22, %v330_v29  ;;  %vm333_vm2 = vcmp.eq.s32.totalorder %v327_v22, %v331_v30  ;;  %vm820_vm10 = vmand %vm368_vm8, %vm377_vm9  ;;  %p653_p12 = scmp.ne.s32.totalorder %s651_s24, %s652_s25  ;;  %s656_s27 = scalar_lea.hbm %s885_s2, 2 }
  0x1c   : > { %v267_v9 = vmax.f32 %v258_v1, %v266_v7  ;;  %v276_v10 = vmax.f32 %v259_v2, %v275_v8  ;;  %vm334_vm3 = vcmp.eq.s32.totalorder %v328_v28, %v330_v29  ;;  %vm335_vm4 = vcmp.eq.s32.totalorder %v328_v28, %v331_v30  ;;  %p658_p2 = scmp.lt.s32.totalorder %s656_s27, %s652_s25 }
  0x1d   : > { %vm336_vm5 = vcmp.eq.s32.totalorder %v329_v37, %v330_v29  ;;  %vm337_vm6 = vcmp.eq.s32.totalorder %v329_v37, %v331_v30  ;;  %v338_v44 = vsel %vm332_vm1, %v258_v1, 0.0  ;;  %v340_v45 = vsel %vm334_vm3, %v260_v5, 0.0  ;;  %p654_p13 = pnand %p653_p12, %p773_p4 }
  0x1e   : > { %v268_v11 = vmax.f32 %v267_v9, %v260_v5  ;;  %v277_v12 = vmax.f32 %v276_v10, %v261_v6  ;;  %v339_v46 = vsel %vm333_vm2, %v259_v2, 0.0  ;;  %v341_v47 = vsel %vm335_vm4, %v261_v6, 0.0  ;;  %p659_p3 = por %p658_p2, %p657_p1 }
  0x1f   : > { %v342_v48 = vsel %vm336_vm5, %v262_v3, 0.0  ;;  %v343_v49 = vsel %vm337_vm6, %v263_v4, 0.0  ;;  %v344_v50 = vadd.f32 %v340_v45, %v338_v44  ;;  %v353_v55 = vadd.f32 %v341_v47, %v339_v46  ;;  %p655_p0 = pneg %p654_p13 }
  0x20   : > { %v269_v13 = vrot.slane %v268_v11, 4  ;;  %v278_v14 = vrot.slane %v277_v12, 4  ;;  %v345_v54 = vsel %vm265_vm0, %v342_v48, 0.0  ;;  %v354_v57 = vsel %vm265_vm0, %v343_v49, 0.0 }
  0x21   : > { %v346_v62 = vadd.f32 %v345_v54, %v344_v50  ;;  %v387_v48 = vld [vmem:[#allocation2] ss:$2 sm:$0x3]  ;;  %p660_p5 = pnand %p659_p3, %p655_p0 }
  0x22   : > { %v270_v15 = vmax.f32 %v268_v11, %v269_v13  ;;  %v279_v16 = vmax.f32 %v277_v12, %v278_v14  ;;  %v395_v12 = vld [vmem:[#allocation2 + $0x1] ss:$2 sm:$0x3]  ;;  %v555_v13 = vsel %vm820_vm10, 1.0, %v716_v0 }
  0x23   : > { %v347_v8 = vrot.slane %v346_v62, 4 }
  0x24   : > { %v271_v18 = vrot.slane %v270_v15, 2  ;;  %v280_v19 = vrot.slane %v279_v16, 2 }
  0x26   : > { %v272_v20 = vmax.f32 %v270_v15, %v271_v18  ;;  %v281_v21 = vmax.f32 %v279_v16, %v280_v19  ;;  %v398_v15 = vadd.f32 %v555_v13, %v395_v12  ;;  %v366_v13 = vand.u32 127, %v326_v17 }
  0x28   : > { %v273_v24 = vrot.slane %v272_v20, 1  ;;  %v282_v25 = vrot.slane %v281_v21, 1  ;;  %399 = vst.msk [vmem:[#allocation2 + $0x1] ss:$2 sm:$0x3] %vm828_vm11, %v398_v15  ;;  %vm440_vm12 = vcmp.eq.s32.totalorder %v366_v13, 1 }
  0x29   : > { %vm439_vm13 = vcmp.eq.s32.totalorder %v366_v13, 0 }
  0x2a   : > { %v802_v26 = vmax.f32 %v272_v20, %v273_v24  ;;  %v804_v27 = vmax.f32 %v281_v21, %v282_v25  ;;  %v348_v21 = vadd.f32 %v347_v8, %v346_v62 }
  0x2c   : > { %v284_v31 = vsub.f32 %v258_v1, %v802_v26  ;;  %v285_v32 = vsub.f32 %v259_v2, %v804_v27  ;;  %v286_v33 = vsub.f32 %v260_v5, %v802_v26  ;;  %v287_v34 = vsub.f32 %v261_v6, %v804_v27 }
  0x2d   : > { %v288_v35 = vsub.f32 %v262_v3, %v802_v26  ;;  %v289_v36 = vsub.f32 %v263_v4, %v804_v27  ;;  %v355_v2 = vadd.f32 %v354_v57, %v353_v55  ;;  %v349_v0 = vrot.slane %v348_v21, 2 }
  0x2e   : > { %v290_v38 = vmul.f32 1.442695, %v284_v31  ;;  %v292_v39 = vmul.f32 1.442695, %v285_v32  ;;  %v294_v40 = vmul.f32 1.442695, %v286_v33 }
  0x2f   : > { %v296_v41 = vmul.f32 1.442695, %v287_v34  ;;  %v298_v42 = vmul.f32 1.442695, %v288_v35  ;;  %v300_v43 = vmul.f32 1.442695, %v289_v36  ;;  %v350_v33 = vadd.f32 %v349_v0, %v348_v21 }
  0x30   : > { %620 = vpow2.f32 %v290_v38  ;;  %v356_v11 = vrot.slane %v355_v2, 4 }
  0x31   : > { %622 = vpow2.f32 %v292_v39  ;;  %v351_v35 = vrot.slane %v350_v33, 1 }
  0x32   : > { %624 = vpow2.f32 %v294_v40  ;;  %v357_v22 = vadd.f32 %v356_v11, %v355_v2 }
  0x33   : > { %626 = vpow2.f32 %v296_v41  ;;  %v352_v41 = vadd.f32 %v351_v35, %v350_v33 }
  0x34   : > { %628 = vpow2.f32 %v298_v42  ;;  %v358_v29 = vrot.slane %v357_v22, 2 }
  0x35   : > { %630 = vpow2.f32 %v300_v43 }
  0x36   : > { %v621_v53 = vpop.eup %620  ;;  %v359_v34 = vadd.f32 %v358_v29, %v357_v22 }
  0x37   : > { %v623_v56 = vpop.eup %622 }
  0x38   : > { %v625_v59 = vpop.eup %624  ;;  %v360_v36 = vrot.slane %v359_v34, 1 }
  0x39   : > { %v627_v60 = vpop.eup %626  ;;  %v302_v61 = vadd.f32 %v625_v59, %v621_v53  ;;  %v421_v53 = vld [vmem:[#allocation2 + $0x1] ss:$2 sm:$0x3] }
  0x3a   : > { %v629_v63 = vpop.eup %628  ;;  %v311_v1 = vadd.f32 %v627_v60, %v623_v56  ;;  %v361_v42 = vadd.f32 %v360_v36, %v359_v34  ;;  %v423_v56 = vperm.slane %v421_v53, 0  ;;  %v424_v57 = vperm.slane %v421_v53, 1 }
  0x3b   : > { %v631_v3 = vpop.eup %630  ;;  %v303_v4 = vsel %vm265_vm0, %v629_v63, 0.0 }
  0x3c   : > { %v304_v5 = vadd.f32 %v303_v4, %v302_v61  ;;  %v312_v6 = vsel %vm265_vm0, %v631_v3, 0.0  ;;  %v427_v59 = vsel %vm375_vm7, %v423_v56, 0.0  ;;  %v428_v60 = vsel %vm375_vm7, %v424_v57, 0.0 }
  0x3d   : > { %v313_v7 = vadd.f32 %v312_v6, %v311_v1  ;;  %v429_v61 = vadd.f32 %v428_v60, %v427_v59 }
  0x3e   : > { %v305_v10 = vrot.slane %v304_v5, 4 }
  0x3f   : > { %v314_v14 = vrot.slane %v313_v7, 4 }
  0x40   : > { %v306_v16 = vadd.f32 %v305_v10, %v304_v5 }
  0x41   : > { %v315_v19 = vadd.f32 %v314_v14, %v313_v7 }
  0x42   : > { %v307_v20 = vrot.slane %v306_v16, 2 }
  0x43   : > { %v316_v23 = vrot.slane %v315_v19, 2 }
  0x44   : > { %v308_v24 = vadd.f32 %v307_v20, %v306_v16 }
  0x45   : > { %v317_v25 = vadd.f32 %v316_v23, %v315_v19 }
  0x46   : > { %v309_v28 = vrot.slane %v308_v24, 1 }
  0x47   : > { %v318_v30 = vrot.slane %v317_v25, 1 }
  0x48   : > { %v310_v31 = vadd.f32 %v309_v28, %v308_v24 }
  0x49   : > { %v319_v32 = vadd.f32 %v318_v30, %v317_v25 }
  0x4a   : > { %632 = vlog2.f32 %v310_v31 }
  0x4b   : > { %634 = vlog2.f32 %v319_v32 }
  0x50   : > { %v633_v37 = vpop.eup %632 }
  0x51   : > { %v635_v38 = vpop.eup %634  ;;  %v321_v39 = vmul.f32 0.6931472, %v633_v37 }
  0x52   : > { %v323_v40 = vmul.f32 0.6931472, %v635_v38 }
  0x53   : > { %v324_v43 = vadd.f32 %v321_v39, %v802_v26 }
  0x54   : > { %v325_v44 = vadd.f32 %v323_v40, %v804_v27 }
  0x55   : > { %v379_v45 = vsub.f32 %v324_v43, %v352_v41 }
  0x56   : > { %v380_v46 = vsub.f32 %v325_v44, %v361_v42 }
  0x58   : > { %v383_v47 = vrot.slane %v380_v46, 7 }
  0x5a   : > { %v384_v49 = vsel %vm375_vm7, %v379_v45, %v383_v47 }
  0x5b   : > { %v386_v50 = vsel %vm820_vm10, %v384_v49, 0.0 }
  0x5c   : > { %v388_v51 = vadd.f32 %v387_v48, %v386_v50 }
  0x5e   : > { %393 = vst.msk [vmem:[#allocation2] ss:$2 sm:$0x3] %vm828_vm11, %v388_v51 }
  0x65   : > { %v403_v52 = vld [vmem:[#allocation2] ss:$2 sm:$0x3] }
  0x66   : > { %v405_v54 = vperm.slane %v403_v52, 0  ;;  %v406_v55 = vperm.slane %v403_v52, 1 }
  0x68   : > { %v409_v26 = vsel %vm375_vm7, %v405_v54, 0.0  ;;  %v410_v27 = vsel %vm375_vm7, %v406_v55, 0.0 }
  0x69   : > { %v411_v58 = vadd.f32 %v410_v27, %v409_v26 }
  0x6b   : > { %412 = vadd.xlane.f32.xlu0 %v411_v58 }
  0x73   : > { %430 = vadd.xlane.f32.xlu0 %v429_v61 }
  0xde   : > { %v413_v62 = vpop.xlane.xlu0 %412 }
  0xdf   : > { %v414_v63 = vrot.slane %v413_v62, 4 }
  0xe1   : > { %v415_v1 = vadd.f32 %v414_v63, %v413_v62 }
  0xe3   : > { %v416_v2 = vrot.slane %v415_v1, 2 }
  0xe5   : > { %v417_v3 = vadd.f32 %v416_v2, %v415_v1 }
  0xe6   : > { %v431_v4 = vpop.xlane.xlu0 %430 }
  0xe7   : > { %v432_v5 = vrot.slane %v431_v4, 4  ;;  %v418_v6 = vrot.slane %v417_v3, 1 }
  0xe9   : > { %v433_v7 = vadd.f32 %v432_v5, %v431_v4  ;;  %v419_v8 = vadd.f32 %v418_v6, %v417_v3 }
  0xeb   : > { %v434_v9 = vrot.slane %v433_v7, 2  ;;  %559 = vpush %v419_v8 }
  0xed   : > { %v435_v10 = vadd.f32 %v434_v9, %v433_v7 }
  0xef   : > { %v436_v11 = vrot.slane %v435_v10, 1 }
  0xf1   : > { %v437_v12 = vadd.f32 %v436_v11, %v435_v10 }
  0xf3   : > { %561 = vpush %v437_v12 }
 0x11c   : > { %s560_s16 = spop %559 }
 0x11d   : > { %v443_v15 = vstv %s560_s16 }
 0x124   : > { %s562_s20 = spop %561 }
 0x125   : > { %v441_v14 = vstv %s562_s20 }
 0x126   : > { %v442_v16 = vsel %vm440_vm12, %v441_v14, 0.0 }
 0x127   : > { %v444_v18 = vsel %vm439_vm13, %v443_v15, %v442_v16 }
 0x128   : > { %445 = vst [vmem:[%s221_s8] sm:$0x1] %v444_v18 }
 0x129   : > { %663 = shalt.err (!%p660_p5)
}
 0x12a   : > { %563 = dma.vmem_to_hbm [thread:$0]  (%p773_p4), %s459_s15, 16, %s461_s18, %s447_s23  }
 0x12b PF: > { %p569_p6 = scmp.ge.s32.totalorder %s714_s14, 2  ;;  %s472_s30 = sand.u32 1, %s694_s9  }
 0x12c   : > { %s473_s3 = scalar_lea.sflag [#allocation4], %s472_s30 }
 0x12d   : > { %p566_p7 = pnand %p569_p6, %p780_p8 }
 0x12f   : > { %p567_p9 = pneg %p566_p7 }
 0x131   : > { %689 = dma.done.wait (%p567_p9), %s473_s3, 16  }
 0x132   : > { %691 = vsyncadd (%p567_p9), %s473_s3, 4294967280  ;;  %s15_s14 = sadd.s32 1, %s714_s14   ;;  %s892_s9 = smov %s698_s10 }
 0x133   : > { %p12_p10 = scmp.ge.s32.totalorder %s15_s14, 4   ;;  %s893_s10 = smov %s702_s11 }
 0x134   : > { %s894_s11 = smov %s786_s22  ;;  %s895_s12 = smov %s710_s13 }
 0x135   : > { %s896_s13 = smov %s898_s17  ;;  %14 = sbr.rel (!%p12_p10) target bundleno = 4 (0x4), region = 75 }
 0x13a   :  { %478 = vsyncpa [#allocation4], 1 }
 0x13b   :  { %480 = vsyncpa [#allocation4 + $0x1], 1 }

</bundles_post_ra>
